<compile_context>
chip_gen: v5e
topology: v5e:2x2
jax: 0.10.0
libtpu: 0.0.40
codegen_flags: <defaults>
</compile_context>

<pallas_src>
import functools

import jax
import jax.numpy as jnp
from jax.experimental import pallas as pl
from jax.experimental.pallas import tpu as pltpu


def _coupling_kernel(upd_ref, cond_ref, w1_ref, b1_ref, w2s_ref, b2s_ref, o_ref,
                     *, compute_dtype):
    # upd_ref : [TB, D]  half that gets updated (q if update_q else p)
    # cond_ref: [TB, D]  half fed to the conditioner (p if update_q else q)
    # w1      : [D, H], b1: [1, H], w2s: [H, D] (shift-only), b2s: [1, D]
    cond = cond_ref[...]
    w1 = w1_ref[...]
    w2s = w2s_ref[...]
    if compute_dtype is not None:
        cond = cond.astype(compute_dtype)
        w1 = w1.astype(compute_dtype)
        w2s = w2s.astype(compute_dtype)

    # conditioner MLP: MXU matmuls (f32 accumulation), EUP tanh
    h = jnp.tanh(
        jnp.dot(cond, w1, preferred_element_type=jnp.float32) + b1_ref[...]
    )
    if compute_dtype is not None:
        h = h.astype(compute_dtype)
    shift = jnp.dot(h, w2s, preferred_element_type=jnp.float32) + b2s_ref[...]

    # symplectic update of the chosen half, done in f32
    o_ref[...] = (upd_ref[...].astype(jnp.float32) + shift).astype(o_ref.dtype)


def _pick_batch_tile(B):
    # Prefer large M tiles (amortize MXU fill/drain, keep DMA >> grid-step
    # overhead); fall back to the full batch when nothing divides evenly
    # (full-extent block satisfies the (8,128) rule).
    for cand in (1024, 512, 256, 128):
        if B % cand == 0:
            return cand
    return B


def symplectic_coupling_layer(x, w1, b1, w2, b2, *, update_q=True,
                              block_b=None, compute_dtype=None):
    """x: [B, 2D]; w1: [D, H]; b1: [H]; w2: [H, 2D]; b2: [2D] -> [B, 2D].

    compute_dtype=jnp.bfloat16 is recommended on v6e/v7x (f32 accumulation is
    kept regardless); default None keeps full input precision.
    """
    B, two_d = x.shape
    D = two_d // 2
    H = w1.shape[1]
    assert w1.shape == (D, H)
    assert w2.shape == (H, 2 * D)

    q = x[:, :D]
    p = x[:, D:]
    upd, cond = (q, p) if update_q else (p, q)

    # Shift-only slice of the second linear: the "scale" half is never used.
    w2s = w2[:, :D]
    b2s = b2[:D].reshape(1, D)
    b1_2d = b1.reshape(1, H)

    if block_b is None:
        block_b = _pick_batch_tile(B)
    assert B % block_b == 0
    grid = (B // block_b,)

    itemsize = jnp.dtype(x.dtype).itemsize
    cost = pl.CostEstimate(
        flops=2 * B * D * H + 2 * B * H * D,
        transcendentals=B * H,
        bytes_accessed=(3 * B * D) * itemsize            # q/p in, updated half out
        + (D * H + H + H * D + D) * itemsize,            # conditioner params
    )

    kernel = functools.partial(_coupling_kernel, compute_dtype=compute_dtype)

    upd_new = pl.pallas_call(
        kernel,
        out_shape=jax.ShapeDtypeStruct((B, D), x.dtype),
        grid_spec=pltpu.PrefetchScalarGridSpec(
            num_scalar_prefetch=0,
            grid=grid,
            in_specs=[
                pl.BlockSpec((block_b, D), lambda i: (i, 0)),   # updated half
                pl.BlockSpec((block_b, D), lambda i: (i, 0)),   # conditioner input
                pl.BlockSpec((D, H), lambda i: (0, 0)),         # w1 (resident)
                pl.BlockSpec((1, H), lambda i: (0, 0)),         # b1
                pl.BlockSpec((H, D), lambda i: (0, 0)),         # w2 shift-only
                pl.BlockSpec((1, D), lambda i: (0, 0)),         # b2 shift-only
            ],
            out_specs=pl.BlockSpec((block_b, D), lambda i: (i, 0)),
        ),
        compiler_params=pltpu.CompilerParams(
            dimension_semantics=("parallel",),
        ),
        cost_estimate=cost,
    )(upd, cond, w1, b1_2d, w2s, b2s)

    # Pass-through half never went through the kernel output path.
    if update_q:
        return jnp.concatenate([upd_new, p], axis=-1)
    return jnp.concatenate([q, upd_new], axis=-1)

# TODO(synk): multi-layer flows should stack per-layer weights and fuse L
# coupling layers into one pallas_call (L as a grid axis, q/p in VMEM scratch)
# to amortize launch + weight DMA; single-layer forward only here.


def _reference(x, w1, b1, w2, b2, *, update_q=True):
    D = x.shape[-1] // 2
    q, p = x[..., :D], x[..., D:]
    cond_in = p if update_q else q
    h = jnp.tanh(cond_in @ w1 + b1)
    ss = h @ w2 + b2
    shift = ss[..., :D]
    if update_q:
        q = q + shift
    else:
        p = p + shift
    return jnp.concatenate([q, p], axis=-1)


if __name__ == "__main__":
    D = 16     # q / p dimension (x has 2*D = 32 features)
    H = 32     # conditioner hidden width

    key = jax.random.PRNGKey(0)
    kx, k1, k2, k3, k4, kx2 = jax.random.split(key, 6)

    # Deterministic conditioner parameters (Linear(D,H) -> tanh -> Linear(H,2D)).
    w1 = jax.random.normal(k1, (D, H), dtype=jnp.float32) * 0.1
    b1 = jax.random.normal(k2, (H,), dtype=jnp.float32) * 0.1
    w2 = jax.random.normal(k3, (H, 2 * D), dtype=jnp.float32) * 0.1
    b2 = jax.random.normal(k4, (2 * D,), dtype=jnp.float32) * 0.1

    # --- case 1: tiny batch (single grid step, full-extent block), update_q=True
    B = 8
    x = jax.random.normal(kx, (B, 2 * D), dtype=jnp.float32)
    out = jax.block_until_ready(
        symplectic_coupling_layer(x, w1, b1, w2, b2, update_q=True))
    ref = _reference(x, w1, b1, w2, b2, update_q=True)
    assert out.shape == (B, 2 * D)
    assert jnp.allclose(out, ref, atol=1e-5, rtol=1e-5)

    # --- case 2: larger batch exercising the pipelined batch grid, update_q=False
    B2 = 256
    x2 = jax.random.normal(kx2, (B2, 2 * D), dtype=jnp.float32)
    out2 = jax.block_until_ready(
        symplectic_coupling_layer(x2, w1, b1, w2, b2, update_q=False))
    ref2 = _reference(x2, w1, b1, w2, b2, update_q=False)
    assert out2.shape == (B2, 2 * D)
    assert jnp.allclose(out2, ref2, atol=1e-5, rtol=1e-5)

    # --- case 3: bf16 matmul operands (v6e/v7x path), f32 accumulation
    out3 = jax.block_until_ready(
        symplectic_coupling_layer(x2, w1, b1, w2, b2, update_q=True,
                                  compute_dtype=jnp.bfloat16))
    ref3 = _reference(x2, w1, b1, w2, b2, update_q=True)
    assert jnp.allclose(out3, ref3, atol=5e-2, rtol=5e-2)

    print("KERNEL_OK")
</pallas_src>

<mosaic_0001>
module attributes {stable_mosaic.version = 11 : i64} {
  func.func @_coupling_kernel(%arg0: i32, %arg1: memref<8x16xf32, #tpu.memory_space<vmem>>, %arg2: memref<8x16xf32, #tpu.memory_space<vmem>>, %arg3: memref<16x32xf32, #tpu.memory_space<vmem>>, %arg4: memref<1x32xf32, #tpu.memory_space<vmem>>, %arg5: memref<32x16xf32, #tpu.memory_space<vmem>>, %arg6: memref<1x16xf32, #tpu.memory_space<vmem>>, %arg7: memref<8x16xf32, #tpu.memory_space<vmem>>) attributes {dimension_semantics = [#tpu.dimension_semantics<parallel>], iteration_bounds = array<i64: 1>, scalar_prefetch = 0 : i64, scratch_operands = 0 : i64, tpu.core_type = #tpu.core_type<tc>, window_params = [{transform_indices = @transform_0, window_bounds = array<i64: 8, 16>}, {transform_indices = @transform_1, window_bounds = array<i64: 8, 16>}, {pipeline_mode = #tpu.pipeline_mode<synchronous>, transform_indices = @transform_2, window_bounds = array<i64: 16, 32>}, {pipeline_mode = #tpu.pipeline_mode<synchronous>, transform_indices = @transform_3, window_bounds = array<i64: 1, 32>}, {pipeline_mode = #tpu.pipeline_mode<synchronous>, transform_indices = @transform_4, window_bounds = array<i64: 32, 16>}, {pipeline_mode = #tpu.pipeline_mode<synchronous>, transform_indices = @transform_5, window_bounds = array<i64: 1, 16>}, {transform_indices = @transform_6, window_bounds = array<i64: 8, 16>}]} {
    %c0 = arith.constant 0 : index
    %c0_0 = arith.constant 0 : index
    %0 = vector.load %arg2[%c0, %c0_0] : memref<8x16xf32, #tpu.memory_space<vmem>>, vector<8x16xf32>
    %c0_1 = arith.constant 0 : index
    %c0_2 = arith.constant 0 : index
    %1 = vector.load %arg3[%c0_1, %c0_2] : memref<16x32xf32, #tpu.memory_space<vmem>>, vector<16x32xf32>
    %c0_3 = arith.constant 0 : index
    %c0_4 = arith.constant 0 : index
    %2 = vector.load %arg5[%c0_3, %c0_4] : memref<32x16xf32, #tpu.memory_space<vmem>>, vector<32x16xf32>
    %cst = arith.constant dense<0.000000e+00> : vector<8x32xf32>
    %3 = tpu.matmul %0, %1, %cst {dimension_numbers = #tpu.dot_dimension_numbers<[1], [0], [0], [1], [0, 0, 1, 1], [], []>} : vector<8x16xf32>, vector<16x32xf32>, vector<8x32xf32> -> vector<8x32xf32>
    %c0_5 = arith.constant 0 : index
    %c0_6 = arith.constant 0 : index
    %4 = vector.load %arg4[%c0_5, %c0_6] : memref<1x32xf32, #tpu.memory_space<vmem>>, vector<1x32xf32>
    %5 = vector.broadcast %4 : vector<1x32xf32> to vector<8x32xf32>
    %6 = arith.addf %3, %5 : vector<8x32xf32>
    %7 = math.tanh %6 : vector<8x32xf32>
    %cst_7 = arith.constant dense<0.000000e+00> : vector<8x16xf32>
    %8 = tpu.matmul %7, %2, %cst_7 {dimension_numbers = #tpu.dot_dimension_numbers<[1], [0], [0], [1], [0, 0, 1, 1], [], []>} : vector<8x32xf32>, vector<32x16xf32>, vector<8x16xf32> -> vector<8x16xf32>
    %c0_8 = arith.constant 0 : index
    %c0_9 = arith.constant 0 : index
    %9 = vector.load %arg6[%c0_8, %c0_9] : memref<1x16xf32, #tpu.memory_space<vmem>>, vector<1x16xf32>
    %10 = vector.broadcast %9 : vector<1x16xf32> to vector<8x16xf32>
    %11 = arith.addf %8, %10 : vector<8x16xf32>
    %c0_10 = arith.constant 0 : index
    %c0_11 = arith.constant 0 : index
    %12 = vector.load %arg1[%c0_10, %c0_11] : memref<8x16xf32, #tpu.memory_space<vmem>>, vector<8x16xf32>
    %13 = arith.addf %12, %11 : vector<8x16xf32>
    %c0_12 = arith.constant 0 : index
    %c0_13 = arith.constant 0 : index
    %14 = vector.load %arg7[%c0_12, %c0_13] : memref<8x16xf32, #tpu.memory_space<vmem>>, vector<8x16xf32>
    tpu.vector_store %arg7[%c0_12, %c0_13], %13 {strides = array<i32>} : memref<8x16xf32, #tpu.memory_space<vmem>>, vector<8x16xf32>,
    return
  }
  func.func @transform_0(%arg0: i32) -> (i32, i32) {
    %c0_i32 = arith.constant 0 : i32
    %c0_i32_0 = arith.constant 0 : i32
    return %arg0, %c0_i32 : i32, i32
  }
  func.func @transform_1(%arg0: i32) -> (i32, i32) {
    %c0_i32 = arith.constant 0 : i32
    %c0_i32_0 = arith.constant 0 : i32
    return %arg0, %c0_i32 : i32, i32
  }
  func.func @transform_2(%arg0: i32) -> (i32, i32) {
    %c0_i32 = arith.constant 0 : i32
    %c0_i32_0 = arith.constant 0 : i32
    %c0_i32_1 = arith.constant 0 : i32
    return %c0_i32, %c0_i32_0 : i32, i32
  }
  func.func @transform_3(%arg0: i32) -> (i32, i32) {
    %c0_i32 = arith.constant 0 : i32
    %c0_i32_0 = arith.constant 0 : i32
    %c0_i32_1 = arith.constant 0 : i32
    return %c0_i32, %c0_i32_0 : i32, i32
  }
  func.func @transform_4(%arg0: i32) -> (i32, i32) {
    %c0_i32 = arith.constant 0 : i32
    %c0_i32_0 = arith.constant 0 : i32
    %c0_i32_1 = arith.constant 0 : i32
    return %c0_i32, %c0_i32_0 : i32, i32
  }
  func.func @transform_5(%arg0: i32) -> (i32, i32) {
    %c0_i32 = arith.constant 0 : i32
    %c0_i32_0 = arith.constant 0 : i32
    %c0_i32_1 = arith.constant 0 : i32
    return %c0_i32, %c0_i32_0 : i32, i32
  }
  func.func @transform_6(%arg0: i32) -> (i32, i32) {
    %c0_i32 = arith.constant 0 : i32
    %c0_i32_0 = arith.constant 0 : i32
    return %arg0, %c0_i32 : i32, i32
  }
}

</mosaic_0001>

<bundles_post_ra>
// kernel: tpu_custom_call.1
= control target key start
LH: loop header
LB: loop body
LE: loop exit
PB: predicated region body
PF: predicated region fallthrough
CT: control target
= control target key end

     0   :  { %vm35_vm0 = vcmask 130048   ;;  %s211_s0 = inlined_call_operand.vmem [shape: f32[8,16], index: 0, kind: input, shape index: {}]   ;;  %s212_s1 = inlined_call_operand.vmem [shape: f32[8,16], index: 1, kind: input, shape index: {}]   ;;  %s213_s2 = inlined_call_operand.vmem [shape: f32[16,32], index: 2, kind: input, shape index: {}]   ;;  %s214_s3 = inlined_call_operand.vmem [shape: f32[1,32], index: 3, kind: input, shape index: {}]   ;;  %s215_s4 = inlined_call_operand.vmem [shape: f32[32,16], index: 4, kind: input, shape index: {}]   ;;  %s216_s5 = inlined_call_operand.vmem [shape: f32[1,16], index: 5, kind: input, shape index: {}]   ;;  %s217_s6 = inlined_call_operand.hbm [shape: f32[8,16], index: 6, kind: output, shape index: {}]  }
   0x1   :  { %v26_v0 = vld [vmem:[%s213_s2 + $0x8] sm:$0xff]  ;;  %v25_v1 = vld [vmem:[%s213_s2] sm:$0xff] }
   0x2   :  { %53 = vmatpush.msra.mxu0 %v26_v0  ;;  %v24_v2 = vld [vmem:[%s212_s1] sm:$0xff] }
   0x3   :  { %11 = vsyncpa [#allocation3], 0  ;;  %v30_v3 = vld [vmem:[%s215_s4 + $0x18] sm:$0xff]  ;;  %v29_v4 = vld [vmem:[%s215_s4 + $0x10] sm:$0xff]  ;;  %vm64_vm1 = vcmask 261120  }
   0x4   :  { %54 = vmatpush.msra.mxu0 %v25_v1  ;;  %80 = vmatpush.msra.mxu1 %v30_v3  ;;  %v28_v5 = vld [vmem:[%s215_s4 + $0x8] sm:$0xff]  ;;  %v27_v6 = vld [vmem:[%s215_s4] sm:$0xff]  ;;  %s140_s4 = smov [#allocation2]  }
   0x5   :  { %107 = vmatmul.msk.f32.vlgmr.msra.gmra.mxu0 %vm35_vm0, %v24_v2  ;;  %v110_v7 = vld [vmem:[%s214_s3] ss:$0 sm:$0xff]  ;;  %s96_s15 = sshll.u32 %s140_s4, 4  ;;  %s98_s3 = sshll.u32 %s217_s6, 4  ;;  %s97_s15 = int_to_ptr.vmem [resolvable:$true] %s96_s15  ;;  %s99_s3 = int_to_ptr.hbm [resolvable:$true] %s98_s3 }
   0x6   :  { %81 = vmatpush.msra.mxu1 %v29_v4  ;;  %v111_v11 = vld [vmem:[%s216_s5] ss:$0 sm:$0xff] }
   0x7   :  { %v88_v13 = vld [vmem:[%s211_s0] sm:$0xff] }
   0x8   :  { %82 = vmatpush.msra.mxu1 %v28_v5 }
   0xa   :  { %83 = vmatpush.msra.mxu1 %v27_v6 }
  0x82   :  { %v56_v8 = vpop.f32.mrf.mxu0 }
  0x83   :  { %v57_v9 = vadd.f32 %v110_v7, %v56_v8 }
  0x85   :  { %112 = vtanh.f32 %v57_v9 }
  0x8b   :  { %v113_v10 = vpop.eup %112 }
  0x8c   :  { %108 = vmatmul.msk.f32.vlgmr.msra.gmra.mxu1 %vm64_vm1, %v113_v10 }
 0x109   :  { %v85_v12 = vpop.f32.mrf.mxu1 }
 0x10a   :  { %v86_v14 = vadd.f32 %v111_v11, %v85_v12 }
 0x10c   :  { %v89_v15 = vadd.f32 %v88_v13, %v86_v14 }
 0x10e   :  { %90 = vst.msk [vmem:[#allocation2] sm:$0xff] %vm35_vm0, %v89_v15 }
 0x10f   :  { %101 = dma.vmem_to_hbm [thread:$0]  %s97_s15, 128, %s99_s3, [#allocation3]  }
 0x110   :  { %138 = dma.done.wait [#allocation3], 128  }
 0x111   :  { %139 = vsyncadd [#allocation3], 4294967168 }
 0x112   :  { %106 = vsyncpa [#allocation3], 1 }

</bundles_post_ra>
